<compile_context>
chip_gen: v7x
topology: tpu7x:2x2x1
jax: 0.10.0
libtpu: 0.0.40
codegen_flags: <defaults>
</compile_context>

<pallas_src>
import functools

import jax
import jax.numpy as jnp
from jax.experimental import pallas as pl
from jax.experimental.pallas import tpu as pltpu

INPUT_DIM = 3
HIDDEN_DIM = 100
OUTPUT_DIM = 4

_LANE = 128      # lane width (fast axis)
_SUBLANE = 8     # sublane width

# Batch-tile (lane) width per grid step.  Large to amortize per-step overhead;
# per-step buffers stay tiny (x^T tile 8*4096*4 B = 128 KiB, each output tile
# 4*4096*4 B = 64 KiB, hidden intermediate 128*4096*4 B = 2 MiB).
DEFAULT_BLOCK_BATCH = 4096


def _round_up(n, m):
    return ((n + m - 1) // m) * m


def _mlp_kernel(xt_ref, w1_ref, w2_ref, *out_refs, want_logits, want_probs):
    # xt: (IP, TB)  f32, lane-dense, row `input_dim` is the constant-1 bias feature.
    # w1: (HP, IP)  f32, fc1.weight with fc1.bias folded into column `input_dim`
    #               and a "ones-producer" row at index `hidden_dim`.
    # w2: (O,  HP)  f32, fc2.weight with fc2.bias folded into column `hidden_dim`.
    xt = xt_ref[...]

    # fc1 (+ folded bias) on the MXU, f32 accumulation.  ReLU keeps the
    # ones-producer row at exactly 1.0 so the fc2 bias fold stays exact.
    h = jnp.dot(w1_ref[...], xt, preferred_element_type=jnp.float32)
    h = jnp.maximum(h, 0.0)                                   # (HP, TB)

    # fc2 (+ folded bias) on the MXU, f32.
    logits = jnp.dot(w2_ref[...], h, preferred_element_type=jnp.float32)  # (O, TB)

    idx = 0
    if want_logits:
        out_refs[idx][...] = logits.astype(out_refs[idx].dtype)
        idx += 1
    if want_probs:
        # Numerically stable softmax over the class axis (sublane axis here,
        # only OUTPUT_DIM rows -> cheap reduce).
        m = jnp.max(logits, axis=0, keepdims=True)            # (1, TB)
        e = jnp.exp(logits - m)
        s = jnp.sum(e, axis=0, keepdims=True)
        r = pl.reciprocal(s, approx=True)                     # EUP slot (idle)
        r = r * (2.0 - s * r)                                  # one Newton step
        out_refs[idx][...] = (e * r).astype(out_refs[idx].dtype)


def pack_params(fc1_weight, fc1_bias, fc2_weight, fc2_bias):
    """Fold PyTorch-layout parameters into two MXU-ready f32 matrices.

    fc1_weight: (H, I)  fc1_bias: (H,)  fc2_weight: (O, H)  fc2_bias: (O,)
    Returns:
      w1p: (HP, IP) with IP = round_up(I+1, 8), HP = round_up(H+1, 128).
           Column I carries fc1_bias; row H is a "ones producer" so that
           h[H, :] == 1 after ReLU.
      w2p: (O, HP) with column H carrying fc2_bias.
    """
    fc1_weight = jnp.asarray(fc1_weight, jnp.float32)
    fc1_bias = jnp.asarray(fc1_bias, jnp.float32).reshape(-1)
    fc2_weight = jnp.asarray(fc2_weight, jnp.float32)
    fc2_bias = jnp.asarray(fc2_bias, jnp.float32).reshape(-1)

    H, I = fc1_weight.shape
    O = fc2_weight.shape[0]
    IP = _round_up(I + 1, _SUBLANE)
    HP = _round_up(H + 1, _LANE)

    w1p = jnp.zeros((HP, IP), jnp.float32)
    w1p = w1p.at[:H, :I].set(fc1_weight)
    w1p = w1p.at[:H, I].set(fc1_bias)     # bias column (x bias-feature == 1)
    w1p = w1p.at[H, I].set(1.0)           # ones-producer: h[H,:] = relu(1*1) = 1

    w2p = jnp.zeros((O, HP), jnp.float32)
    w2p = w2p.at[:, :H].set(fc2_weight)
    w2p = w2p.at[:, H].set(fc2_bias)      # bias column (h ones-row == 1)
    return w1p, w2p


def _mlp_pallas(x, w1p, w2p, in_dim, *, want_logits, want_probs,
                block_batch=DEFAULT_BLOCK_BATCH, out_dtype=jnp.float32):
    batch = x.shape[0]
    HP, IP = w1p.shape
    O = w2p.shape[0]
    assert x.shape[1] == in_dim and in_dim < IP

    # Lane-tile: multiple of 128, large by default, but capped so the grid has
    # at least 2 steps whenever the batch allows it (v7x megacore sharding of
    # the "parallel" axis).
    tb = max(_LANE, min(_round_up(block_batch, _LANE),
                        _round_up(pl.cdiv(batch, 2), _LANE)))
    padded = _round_up(max(batch, 1), tb)
    grid = (padded // tb,)

    # Build the lane-dense transposed input slab in one wrapper-side copy:
    # rows 0..I-1 = x^T, row I = 1.0 (bias feature), remaining rows zero.
    # Padded batch columns are all-zero -> finite garbage, sliced off below.
    xt = jnp.concatenate(
        [x.astype(jnp.float32).T,
         jnp.ones((1, batch), jnp.float32),
         jnp.zeros((IP - in_dim - 1, batch), jnp.float32)], axis=0)
    if padded != batch:
        xt = jnp.pad(xt, ((0, 0), (0, padded - batch)))

    out_shapes, out_specs = [], []
    for flag in (want_logits, want_probs):
        if flag:
            out_shapes.append(jax.ShapeDtypeStruct((O, padded), out_dtype))
            out_specs.append(pl.BlockSpec((O, tb), lambda i: (0, i)))

    kernel = functools.partial(_mlp_kernel,
                               want_logits=want_logits,
                               want_probs=want_probs)

    outs = pl.pallas_call(
        kernel,
        out_shape=tuple(out_shapes),
        grid=grid,
        in_specs=[
            # x^T: streamed one lane-dense batch tile per grid step.
            pl.BlockSpec((IP, tb), lambda i: (0, i)),
            # Packed weights: constant block index -> VMEM-resident.
            pl.BlockSpec((HP, IP), lambda i: (0, 0)),
            pl.BlockSpec((O, HP), lambda i: (0, 0)),
        ],
        out_specs=tuple(out_specs),
        compiler_params=pltpu.CompilerParams(
            dimension_semantics=("parallel",)),
    )(xt, w1p, w2p)

    # Back to the PyTorch (batch, output_dim) layout; drop padded columns.
    return tuple(o[:, :batch].T for o in outs)


def mlp_forward(x, fc1_weight, fc1_bias, fc2_weight, fc2_bias,
                apply_softmax=False, block_batch=DEFAULT_BLOCK_BATCH,
                out_dtype=jnp.float32):
    """Pallas forward pass matching MultilayerPerceptron.forward.

    x: (batch, input_dim) f32; parameters in native PyTorch layout:
    fc1_weight (H, I), fc1_bias (H,), fc2_weight (O, H), fc2_bias (O,).
    Set out_dtype=jnp.bfloat16 to halve output write-back bytes (v5e).
    """
    w1p, w2p = pack_params(fc1_weight, fc1_bias, fc2_weight, fc2_bias)
    (out,) = _mlp_pallas(x, w1p, w2p, x.shape[1],
                         want_logits=not apply_softmax,
                         want_probs=apply_softmax,
                         block_batch=block_batch, out_dtype=out_dtype)
    return out


def mlp_forward_both(x, fc1_weight, fc1_bias, fc2_weight, fc2_bias,
                     block_batch=DEFAULT_BLOCK_BATCH, out_dtype=jnp.float32):
    """Fused variant returning (logits, softmax_probs) from one kernel call."""
    w1p, w2p = pack_params(fc1_weight, fc1_bias, fc2_weight, fc2_bias)
    return _mlp_pallas(x, w1p, w2p, x.shape[1],
                       want_logits=True, want_probs=True,
                       block_batch=block_batch, out_dtype=out_dtype)


if __name__ == "__main__":
    key = jax.random.PRNGKey(0)
    kx, k1, k2, k3, k4 = jax.random.split(key, 5)

    # Deterministic synthetic parameters in PyTorch nn.Linear layout.
    fc1_w = jax.random.normal(k1, (HIDDEN_DIM, INPUT_DIM), jnp.float32) * 0.1
    fc1_b = jax.random.normal(k2, (HIDDEN_DIM,), jnp.float32) * 0.1
    fc2_w = jax.random.normal(k3, (OUTPUT_DIM, HIDDEN_DIM), jnp.float32) * 0.1
    fc2_b = jax.random.normal(k4, (OUTPUT_DIM,), jnp.float32) * 0.1

    def ref(xv, apply_softmax=False):
        h = jnp.maximum(xv @ fc1_w.T + fc1_b, 0.0)
        out = h @ fc2_w.T + fc2_b
        return jax.nn.softmax(out, axis=1) if apply_softmax else out

    # Small demo batch: fused dual-output call (one kernel launch for both).
    batch = 8
    x = jax.random.normal(kx, (batch, INPUT_DIM), jnp.float32)
    logits, probs = mlp_forward_both(x, fc1_w, fc1_b, fc2_w, fc2_b)
    jax.block_until_ready((logits, probs))

    assert logits.shape == (batch, OUTPUT_DIM)
    assert probs.shape == (batch, OUTPUT_DIM)
    assert jnp.allclose(logits, ref(x), atol=1e-2, rtol=1e-2)
    assert jnp.allclose(probs, ref(x, True), atol=5e-3)
    assert jnp.allclose(jnp.sum(probs, axis=1), 1.0, atol=1e-3)

    # Exercise the multi-tile grid + ragged-batch padding path.
    batch2 = 300
    x2 = jax.random.normal(kx, (batch2, INPUT_DIM), jnp.float32)
    out2 = mlp_forward(x2, fc1_w, fc1_b, fc2_w, fc2_b, apply_softmax=False)
    out2_sm = mlp_forward(x2, fc1_w, fc1_b, fc2_w, fc2_b, apply_softmax=True)
    jax.block_until_ready((out2, out2_sm))

    assert out2.shape == (batch2, OUTPUT_DIM)
    assert jnp.allclose(out2, ref(x2), atol=1e-2, rtol=1e-2)
    assert jnp.allclose(out2_sm, ref(x2, True), atol=5e-3)

    print("KERNEL_OK")
</pallas_src>

<mosaic_0001>
module attributes {stable_mosaic.version = 11 : i64} {
  func.func @_mlp_kernel(%arg0: i32, %arg1: memref<8x128xf32, #tpu.memory_space<vmem>>, %arg2: memref<128x8xf32, #tpu.memory_space<vmem>>, %arg3: memref<4x128xf32, #tpu.memory_space<vmem>>, %arg4: memref<4x128xf32, #tpu.memory_space<vmem>>, %arg5: memref<4x128xf32, #tpu.memory_space<vmem>>) attributes {dimension_semantics = [#tpu.dimension_semantics<parallel>], iteration_bounds = array<i64: 1>, scalar_prefetch = 0 : i64, scratch_operands = 0 : i64, tpu.core_type = #tpu.core_type<tc>, window_params = [{transform_indices = @transform_0, window_bounds = array<i64: 8, 128>}, {pipeline_mode = #tpu.pipeline_mode<synchronous>, transform_indices = @transform_1, window_bounds = array<i64: 128, 8>}, {pipeline_mode = #tpu.pipeline_mode<synchronous>, transform_indices = @transform_2, window_bounds = array<i64: 4, 128>}, {transform_indices = @transform_3, window_bounds = array<i64: 4, 128>}, {transform_indices = @transform_4, window_bounds = array<i64: 4, 128>}]} {
    %c0 = arith.constant 0 : index
    %c0_0 = arith.constant 0 : index
    %0 = vector.load %arg1[%c0, %c0_0] : memref<8x128xf32, #tpu.memory_space<vmem>>, vector<8x128xf32>
    %c0_1 = arith.constant 0 : index
    %c0_2 = arith.constant 0 : index
    %1 = vector.load %arg2[%c0_1, %c0_2] : memref<128x8xf32, #tpu.memory_space<vmem>>, vector<128x8xf32>
    %cst = arith.constant dense<0.000000e+00> : vector<128x128xf32>
    %2 = tpu.matmul %1, %0, %cst {dimension_numbers = #tpu.dot_dimension_numbers<[1], [0], [0], [1], [0, 0, 1, 1], [], []>} : vector<128x8xf32>, vector<8x128xf32>, vector<128x128xf32> -> vector<128x128xf32>
    %cst_3 = arith.constant 0.000000e+00 : f32
    %3 = vector.broadcast %cst_3 : f32 to vector<128x128xf32>
    %4 = arith.maximumf %2, %3 : vector<128x128xf32>
    %c0_4 = arith.constant 0 : index
    %c0_5 = arith.constant 0 : index
    %5 = vector.load %arg3[%c0_4, %c0_5] : memref<4x128xf32, #tpu.memory_space<vmem>>, vector<4x128xf32>
    %cst_6 = arith.constant dense<0.000000e+00> : vector<4x128xf32>
    %6 = tpu.matmul %5, %4, %cst_6 {dimension_numbers = #tpu.dot_dimension_numbers<[1], [0], [0], [1], [0, 0, 1, 1], [], []>} : vector<4x128xf32>, vector<128x128xf32>, vector<4x128xf32> -> vector<4x128xf32>
    %c0_7 = arith.constant 0 : index
    %c0_8 = arith.constant 0 : index
    %7 = vector.load %arg4[%c0_7, %c0_8] : memref<4x128xf32, #tpu.memory_space<vmem>>, vector<4x128xf32>
    tpu.vector_store %arg4[%c0_7, %c0_8], %6 {strides = array<i32>} : memref<4x128xf32, #tpu.memory_space<vmem>>, vector<4x128xf32>,
    %cst_9 = arith.constant dense<0xFF800000> : vector<128xf32>
    %8 = vector.multi_reduction <maximumf>, %6, %cst_9 [0] : vector<4x128xf32> to vector<128xf32>
    %9 = vector.shape_cast %8 : vector<128xf32> to vector<1x128xf32>
    %10 = vector.broadcast %9 : vector<1x128xf32> to vector<4x128xf32>
    %11 = arith.subf %6, %10 : vector<4x128xf32>
    %12 = math.exp %11 : vector<4x128xf32>
    %cst_10 = arith.constant dense<0.000000e+00> : vector<128xf32>
    %13 = vector.multi_reduction <add>, %12, %cst_10 [0] : vector<4x128xf32> to vector<128xf32>
    %14 = vector.shape_cast %13 : vector<128xf32> to vector<1x128xf32>
    %15 = tpu.reciprocal %14 {approx = true} : vector<1x128xf32> -> vector<1x128xf32>
    %16 = arith.mulf %14, %15 : vector<1x128xf32>
    %cst_11 = arith.constant 2.000000e+00 : f32
    %17 = vector.broadcast %cst_11 : f32 to vector<1x128xf32>
    %18 = arith.subf %17, %16 : vector<1x128xf32>
    %19 = arith.mulf %15, %18 : vector<1x128xf32>
    %20 = vector.broadcast %19 : vector<1x128xf32> to vector<4x128xf32>
    %21 = arith.mulf %12, %20 : vector<4x128xf32>
    %c0_12 = arith.constant 0 : index
    %c0_13 = arith.constant 0 : index
    %22 = vector.load %arg5[%c0_12, %c0_13] : memref<4x128xf32, #tpu.memory_space<vmem>>, vector<4x128xf32>
    tpu.vector_store %arg5[%c0_12, %c0_13], %21 {strides = array<i32>} : memref<4x128xf32, #tpu.memory_space<vmem>>, vector<4x128xf32>,
    return
  }
  func.func @transform_0(%arg0: i32) -> (i32, i32) {
    %c0_i32 = arith.constant 0 : i32
    %c0_i32_0 = arith.constant 0 : i32
    return %c0_i32, %arg0 : i32, i32
  }
  func.func @transform_1(%arg0: i32) -> (i32, i32) {
    %c0_i32 = arith.constant 0 : i32
    %c0_i32_0 = arith.constant 0 : i32
    %c0_i32_1 = arith.constant 0 : i32
    return %c0_i32, %c0_i32_0 : i32, i32
  }
  func.func @transform_2(%arg0: i32) -> (i32, i32) {
    %c0_i32 = arith.constant 0 : i32
    %c0_i32_0 = arith.constant 0 : i32
    %c0_i32_1 = arith.constant 0 : i32
    return %c0_i32, %c0_i32_0 : i32, i32
  }
  func.func @transform_3(%arg0: i32) -> (i32, i32) {
    %c0_i32 = arith.constant 0 : i32
    %c0_i32_0 = arith.constant 0 : i32
    return %c0_i32, %arg0 : i32, i32
  }
  func.func @transform_4(%arg0: i32) -> (i32, i32) {
    %c0_i32 = arith.constant 0 : i32
    %c0_i32_0 = arith.constant 0 : i32
    return %c0_i32, %arg0 : i32, i32
  }
}

</mosaic_0001>

<bundles_post_ra>
// kernel: tpu_custom_call.1
= control target key start
LH: loop header
LB: loop body
LE: loop exit
PB: predicated region body
PF: predicated region fallthrough
CT: control target
= control target key end

     0   :  { %10 = vsyncpa [#allocation3], 0  ;;  %vm35_vm0 = vcmask 64512   ;;  %s687_s0 = inlined_call_operand.vmem [shape: f32[8,128], index: 0, kind: input, shape index: {}]   ;;  %s688_s1 = inlined_call_operand.vmem [shape: f32[128,8], index: 1, kind: input, shape index: {}]   ;;  %s689_s2 = inlined_call_operand.vmem [shape: f32[4,128], index: 2, kind: input, shape index: {}]   ;;  %s690_s3 = inlined_call_operand.hbm [shape: f32[4,128], index: 3, kind: output, shape index: {0}]   ;;  %s691_s4 = inlined_call_operand.hbm [shape: f32[4,128], index: 4, kind: output, shape index: {1}]  }
   0x1   :  { %v18_v0 = vld [vmem:[%s687_s0] sm:$0xff]  ;;  %v20_v2 = vld [vmem:[%s688_s1 + $0x8] sm:$0xff]  ;;  %v21_v3 = vld [vmem:[%s688_s1 + $0x10] sm:$0xff] }
   0x2   :  { %v19_v1 = vld [vmem:[%s688_s1] sm:$0xff]  ;;  %419 = vmatprep.subr.mxu0 %v18_v0  ;;  %v22_v4 = vld [vmem:[%s688_s1 + $0x18] sm:$0xff] }
   0x3   :  { %421 = vmatprep.mubr.msk.f32.mxu0 %vm35_vm0, %v19_v1  ;;  %420 = vmatpush3.msra.mxu0 %v18_v0  ;;  %v23_v5 = vld [vmem:[%s688_s1 + $0x20] sm:$0xff] }
   0x4   :  { %422 = vmatmul.mubr.msk.f32.vlgmr.msra.gmra.mrb[0].mxu0 %vm35_vm0, %v20_v2 }
   0x5   :  { %424 = vmatprep.mubr.msk.f32.mxu0 %vm35_vm0, %v21_v3 }
   0x6   :  { %11 = vsyncpa [#allocation5], 0  ;;  %v24_v6 = vld [vmem:[%s688_s1 + $0x28] sm:$0xff]  ;;  %v25_v7 = vld [vmem:[%s688_s1 + $0x30] sm:$0xff]  ;;  %v561_v17 = vmov 0.0|0.0   ;;  %vm562_vm1 = vmmov 0  }
   0x7   :  { %v26_v8 = vld [vmem:[%s688_s1 + $0x38] sm:$0xff]  ;;  %v27_v9 = vld [vmem:[%s688_s1 + $0x40] sm:$0xff]  ;;  %v28_v10 = vld [vmem:[%s688_s1 + $0x48] sm:$0xff]  ;;  %480 = vmatprep.subr.bf16.mxu1 %v561_v17  ;;  %v563_v18 = vmov 0.0   ;;  %s564_s0 = smov [#allocation2]   ;;  %vm317_vm2 = vcmask 1043456  }
   0x8   :  { %425 = vmatmul.mubr.msk.f32.gmra.mrb[2].mxu0 %vm35_vm0, %v22_v4  ;;  %v29_v11 = vld [vmem:[%s688_s1 + $0x50] sm:$0xff]  ;;  %v30_v12 = vld [vmem:[%s688_s1 + $0x58] sm:$0xff]  ;;  %v31_v13 = vld [vmem:[%s688_s1 + $0x60] sm:$0xff]  ;;  %477 = vmatprep.mubr.msk.f32.mxu1 %vm562_vm1, %v563_v18  ;;  %s347_s23 = sshll.u32 %s564_s0, 4  ;;  %s348_s23 = int_to_ptr.vmem [resolvable:$true] %s347_s23 }
   0x9   :  { %427 = vmatprep.mubr.msk.f32.mxu0 %vm35_vm0, %v23_v5  ;;  %v32_v14 = vld [vmem:[%s688_s1 + $0x68] sm:$0xff]  ;;  %v33_v15 = vld [vmem:[%s688_s1 + $0x70] sm:$0xff]  ;;  %v34_v16 = vld [vmem:[%s688_s1 + $0x78] sm:$0xff]  ;;  %s513_s24 = scalar_lea.vmem %s348_s23, 64  ;;  %p518_p1 = scmp.lt.s32.totalorder %s348_s23, %s348_s23 }
   0xa   :  { %v245_v59 = vld [vmem:[%s689_s2] sm:$0xf]  ;;  %p514_p0 = scmp.ne.s32.totalorder %s348_s23, %s513_s24  ;;  %p519_p2 = scmp.lt.s32.totalorder %s513_s24, %s513_s24 }
   0xc   :  { %428 = vmatmul.mubr.msk.f32.gmra.mrb[4].mxu0 %vm35_vm0, %v24_v6  ;;  %p520_p3 = por %p519_p2, %p518_p1 }
   0xd   :  { %430 = vmatprep.mubr.msk.f32.mxu0 %vm35_vm0, %v25_v7 }
   0xe   :  { %p521_p4 = pnand %p520_p3, %p514_p0 }
  0x10   :  { %431 = vmatmul.mubr.msk.f32.gmra.mrb[6].mxu0 %vm35_vm0, %v26_v8 }
  0x11   :  { %433 = vmatprep.mubr.msk.f32.mxu0 %vm35_vm0, %v27_v9 }
  0x14   :  { %434 = vmatmul.mubr.msk.f32.gmra.mrb[8].mxu0 %vm35_vm0, %v28_v10 }
  0x15   :  { %436 = vmatprep.mubr.msk.f32.mxu0 %vm35_vm0, %v29_v11 }
  0x18   :  { %437 = vmatmul.mubr.msk.f32.gmra.mrb[10].mxu0 %vm35_vm0, %v30_v12 }
  0x19   :  { %439 = vmatprep.mubr.msk.f32.mxu0 %vm35_vm0, %v31_v13 }
  0x1c   :  { %440 = vmatmul.mubr.msk.f32.gmra.mrb[12].mxu0 %vm35_vm0, %v32_v14 }
  0x1d   :  { %442 = vmatprep.mubr.msk.f32.mxu0 %vm35_vm0, %v33_v15 }
  0x20   :  { %443 = vmatmul.mubr.msk.f32.gmra.mrb[14].mxu0 %vm35_vm0, %v34_v16 }
  0xd7   :  { %v423_v19 = vpop.f32.mrb[0].mxu0 }
  0xd8   :  { %v230_v20 = vmax.f32 %v423_v19, 0.0  ;;  %v150_v21 = vpop.f32.mrb[1].mxu0 }
  0xd9   :  { %v229_v22 = vmax.f32 %v150_v21, 0.0 }
  0xdb   :  { %v426_v23 = vpop.f32.mrb[2].mxu0  ;;  %v481_v24 = vpack.c.bf16 %v230_v20, %v229_v22 }
  0xdc   :  { %v232_v25 = vmax.f32 %v426_v23, 0.0  ;;  %v160_v26 = vpop.f32.mrb[3].mxu0 }
  0xdd   :  { %v231_v27 = vmax.f32 %v160_v26, 0.0  ;;  %482 = vmatpush3.bf16.msra.mxu1 %v481_v24 }
  0xde   :  { %483 = vmatprep.subr.bf16.mxu1 %v561_v17 }
  0xdf   :  { %v484_v28 = vpack.c.bf16 %v232_v25, %v231_v27  ;;  %v429_v29 = vpop.f32.mrb[4].mxu0 }
  0xe0   :  { %v234_v30 = vmax.f32 %v429_v29, 0.0  ;;  %v170_v31 = vpop.f32.mrb[5].mxu0 }
  0xe1   :  { %v233_v32 = vmax.f32 %v170_v31, 0.0  ;;  %485 = vmatpush3.bf16.msra.mxu1 %v484_v28 }
  0xe2   :  { %486 = vmatprep.subr.bf16.mxu1 %v561_v17 }
  0xe3   :  { %v487_v33 = vpack.c.bf16 %v234_v30, %v233_v32  ;;  %v432_v34 = vpop.f32.mrb[6].mxu0 }
  0xe4   :  { %v236_v35 = vmax.f32 %v432_v34, 0.0  ;;  %v180_v36 = vpop.f32.mrb[7].mxu0 }
  0xe5   :  { %v235_v37 = vmax.f32 %v180_v36, 0.0  ;;  %488 = vmatpush3.bf16.msra.mxu1 %v487_v33 }
  0xe6   :  { %489 = vmatprep.subr.bf16.mxu1 %v561_v17 }
  0xe7   :  { %v490_v38 = vpack.c.bf16 %v236_v35, %v235_v37  ;;  %v435_v39 = vpop.f32.mrb[8].mxu0 }
  0xe8   :  { %v238_v40 = vmax.f32 %v435_v39, 0.0  ;;  %v190_v41 = vpop.f32.mrb[9].mxu0 }
  0xe9   :  { %v237_v42 = vmax.f32 %v190_v41, 0.0  ;;  %491 = vmatpush3.bf16.msra.mxu1 %v490_v38 }
  0xea   :  { %492 = vmatprep.subr.bf16.mxu1 %v561_v17 }
  0xeb   :  { %v493_v43 = vpack.c.bf16 %v238_v40, %v237_v42  ;;  %v438_v44 = vpop.f32.mrb[10].mxu0 }
  0xec   :  { %v240_v45 = vmax.f32 %v438_v44, 0.0  ;;  %v200_v46 = vpop.f32.mrb[11].mxu0 }
  0xed   :  { %v239_v47 = vmax.f32 %v200_v46, 0.0  ;;  %494 = vmatpush3.bf16.msra.mxu1 %v493_v43 }
  0xee   :  { %495 = vmatprep.subr.bf16.mxu1 %v561_v17 }
  0xef   :  { %v496_v48 = vpack.c.bf16 %v240_v45, %v239_v47  ;;  %v441_v49 = vpop.f32.mrb[12].mxu0 }
  0xf0   :  { %v242_v50 = vmax.f32 %v441_v49, 0.0  ;;  %v210_v51 = vpop.f32.mrb[13].mxu0 }
  0xf1   :  { %v241_v52 = vmax.f32 %v210_v51, 0.0  ;;  %497 = vmatpush3.bf16.msra.mxu1 %v496_v48 }
  0xf2   :  { %498 = vmatprep.subr.bf16.mxu1 %v561_v17 }
  0xf3   :  { %v499_v53 = vpack.c.bf16 %v242_v50, %v241_v52  ;;  %v444_v54 = vpop.f32.mrb[14].mxu0 }
  0xf4   :  { %v244_v55 = vmax.f32 %v444_v54, 0.0  ;;  %v220_v56 = vpop.f32.mrb[15].mxu0 }
  0xf5   :  { %v243_v57 = vmax.f32 %v220_v56, 0.0  ;;  %500 = vmatpush3.bf16.msra.mxu1 %v499_v53 }
  0xf6   :  { %501 = vmatprep.subr.bf16.mxu1 %v561_v17 }
  0xf7   :  { %v502_v58 = vpack.c.bf16 %v244_v55, %v243_v57 }
  0xf9   :  { %503 = vmatpush3.bf16.msra.mxu1 %v502_v58 }
  0xfc   :  { %478 = vmatmul.mubr.f32.vlgmr.msra.gmra.mrb[0].mxu1 %v245_v59 }
 0x1cf   :  { %v312_v60 = vpop.f32.mrb[0].mxu1 }
 0x1d0   :  { %v318_v61 = vsel %vm317_vm2, %v312_v60, -inf  ;;  %316 = vst [vmem:[#allocation2] sm:$0xf] %v312_v60  ;;  %v479_v62 = vpop.f32.mrb[1].mxu1 }
 0x1d1   :  { %v319_v63 = vrot.slane %v318_v61, 4 }
 0x1d2   :  { %524 = shalt.err (!%p521_p4)
}
 0x1d3   :  { %s525_s26 = scalar_lea.hbm %s690_s3, 64 }
 0x1d4   :  { %p526_p5 = scmp.ne.s32.totalorder %s690_s3, %s525_s26  ;;  %p529_p6 = scmp.lt.u32.totalorder %s525_s26, %s690_s3 }
 0x1d6   :  { %p531_p7 = pnand %p529_p6, %p526_p5 }
 0x1d8   :  { %534 = shalt.err (!%p531_p7)
}
 0x1d9   :  { %350 = dma.vmem_to_hbm [thread:$0]  %s348_s23, 64, %s690_s3, [#allocation3]   ;;  %v320_v0 = vmax.f32 %v318_v61, %v319_v63 }
 0x1da   :  { %s565_s3 = smov [#allocation4]  }
 0x1db   :  { %v321_v1 = vrot.slane %v320_v0, 2  ;;  %s357_s7 = sshll.u32 %s565_s3, 4  ;;  %s358_s7 = int_to_ptr.vmem [resolvable:$true] %s357_s7 }
 0x1dc   :  { %s535_s8 = scalar_lea.vmem %s358_s7, 64  ;;  %p540_p9 = scmp.lt.s32.totalorder %s358_s7, %s358_s7 }
 0x1dd   :  { %v322_v2 = vmax.f32 %v320_v0, %v321_v1  ;;  %p536_p8 = scmp.ne.s32.totalorder %s358_s7, %s535_s8  ;;  %p541_p10 = scmp.lt.s32.totalorder %s535_s8, %s535_s8 }
 0x1df   :  { %v323_v3 = vrot.slane %v322_v2, 1  ;;  %p542_p11 = por %p541_p10, %p540_p9 }
 0x1e1   :  { %v324_v4 = vmax.f32 %v322_v2, %v323_v3  ;;  %p543_p12 = pnand %p542_p11, %p536_p8 }
 0x1e3   :  { %v325_v5 = vsub.f32 %v312_v60, %v324_v4 }
 0x1e5   :  { %v326_v6 = vmul.f32 1.442695, %v325_v5 }
 0x1e7   :  { %509 = vpow2.f32 %v326_v6 }
 0x1f1   :  { %v510_v7 = vpop.eup %509 }
 0x1f2   :  { %v328_v8 = vsel %vm317_vm2, %v510_v7, 0.0 }
 0x1f3   :  { %v329_v9 = vrot.slane %v328_v8, 4 }
 0x1f5   :  { %v330_v10 = vadd.f32 %v329_v9, %v328_v8 }
 0x1f7   :  { %v331_v11 = vrot.slane %v330_v10, 2 }
 0x1f9   :  { %v332_v12 = vadd.f32 %v331_v11, %v330_v10 }
 0x1fb   :  { %v333_v13 = vrot.slane %v332_v12, 1 }
 0x1fd   :  { %v334_v14 = vadd.f32 %v333_v13, %v332_v12 }
 0x1ff   :  { %511 = vrcp.f32 %v334_v14 }
 0x209   :  { %v512_v15 = vpop.eup %511 }
 0x20a   :  { %v336_v16 = vmul.f32 %v512_v15, %v334_v14 }
 0x20c   :  { %v337_v17 = vsub.f32 2.0, %v336_v16 }
 0x20e   :  { %v338_v18 = vmul.f32 %v512_v15, %v337_v17 }
 0x210   :  { %v339_v19 = vmul.f32 %v510_v7, %v338_v18 }
 0x212   :  { %340 = vst [vmem:[#allocation4] sm:$0xf] %v339_v19 }
 0x213   :  { %546 = shalt.err (!%p543_p12)
}
 0x214   :  { %s547_s11 = scalar_lea.hbm %s691_s4, 64 }
 0x215   :  { %p548_p13 = scmp.ne.s32.totalorder %s691_s4, %s547_s11  ;;  %p551_p0 = scmp.lt.u32.totalorder %s547_s11, %s691_s4 }
 0x217   :  { %p553_p1 = pnand %p551_p0, %p548_p13 }
 0x219   :  { %556 = shalt.err (!%p553_p1)
}
 0x21a   :  { %360 = dma.vmem_to_hbm [thread:$0]  %s358_s7, 64, %s691_s4, [#allocation5]  }
 0x21b   :  { %557 = dma.done.wait [#allocation3], 64  }
 0x21c   :  { %558 = vsyncadd [#allocation3], 4294967232 }
 0x21d   :  { %559 = dma.done.wait [#allocation5], 64  }
 0x21e   :  { %560 = vsyncadd [#allocation5], 4294967232 }
 0x21f   :  { %367 = vsyncpa [#allocation3], 1 }
 0x220   :  { %368 = vsyncpa [#allocation5], 1 }

</bundles_post_ra>
